<compile_context>
chip_gen: v7x
topology: tpu7x:2x2x1
jax: 0.10.0
libtpu: 0.0.40
codegen_flags: <defaults>
</compile_context>

<pallas_src>
import jax
import jax.numpy as jnp
from jax import lax
from jax.experimental import pallas as pl
from jax.experimental.pallas import tpu as pltpu


def _round_up(x: int, m: int) -> int:
    return ((x + m - 1) // m) * m


def _exemplar_matmul_kernel(x_ref, em_ref, o_ref):
    """One grid step of logits = inputs @ em.T.

    x_ref : (TB, TK)  block of inputs
    em_ref: (TN, TK)  block of em (NOT transposed; contract over last dims)
    o_ref : (TB, TN)  f32 logits block, resident across the k (reduction) axis
    """
    k = pl.program_id(2)

    part = lax.dot_general(
        x_ref[...],
        em_ref[...],
        dimension_numbers=(((1,), (1,)), ((), ())),  # x @ em^T on the MXU
        preferred_element_type=jnp.float32,
    )

    @pl.when(k == 0)
    def _():
        o_ref[...] = part

    @pl.when(k > 0)
    def _():
        o_ref[...] += part


def exemplar_memory_forward(
    inputs,
    targets,
    em,
    alpha=0.01,
    *,
    compute_dtype=None,      # e.g. jnp.bfloat16: cast in the wrapper -> halves em HBM bytes
    tb=512, tn=1024, tk=2048,  # tile caps; clamped to the (padded) problem size
):
    """Forward of ExemplarMemory: returns inputs @ em.T as float32 logits.

    targets / alpha are unused in forward (they only drive the backward-time
    in-place memory update in the PyTorch autograd.Function).
    """
    # TODO(synk): backward-time exemplar update (em[y] = alpha*em[y] + (1-alpha)*x;
    # renormalize) is a training side effect, not part of forward; when added,
    # alias em via input_output_aliases to avoid copying the full memory bank.
    del targets, alpha

    B, D = inputs.shape
    N, D2 = em.shape
    assert D == D2, "feature dims must match"

    if compute_dtype is not None:
        # Cast BEFORE the pallas_call so the narrow dtype is what is DMA'd.
        inputs = inputs.astype(compute_dtype)
        em = em.astype(compute_dtype)

    # (8,128)-aligned tiles, clamped so small problems don't blow up into huge
    # padded blocks.  TB covers the whole (padded) batch when B is modest so em
    # is streamed from HBM exactly once; TK ideally covers all of D so the
    # reduction axis collapses to a single step.
    TB = min(tb, _round_up(B, 8))
    TN = min(tn, _round_up(N, 128))
    TK = min(tk, _round_up(D, 128))

    Bp = _round_up(B, TB)
    Np = _round_up(N, TN)
    Dp = _round_up(D, TK)

    # Zero-pad only if needed; zeros along D contribute nothing to the dot.
    x_p = inputs if (Bp == B and Dp == D) else jnp.pad(inputs, ((0, Bp - B), (0, Dp - D)))
    em_p = em if (Np == N and Dp == D) else jnp.pad(em, ((0, Np - N), (0, Dp - D)))

    gi, gj, gk = Bp // TB, Np // TN, Dp // TK
    grid = (gi, gj, gk)

    # VMEM budget: double-buffered input tiles + double-buffered f32 output tile.
    buf_bytes = 2 * (
        TB * TK * x_p.dtype.itemsize
        + TN * TK * em_p.dtype.itemsize
        + TB * TN * 4
    )
    vmem_limit = int(min(max(buf_bytes + (4 << 20), 32 << 20), 64 << 20))

    # Actual streamed bytes: x is re-read once per j tile, em once per i tile.
    cost = pl.CostEstimate(
        flops=2 * Bp * Np * Dp,
        transcendentals=0,
        bytes_accessed=(
            gj * Bp * Dp * x_p.dtype.itemsize
            + gi * Np * Dp * em_p.dtype.itemsize
            + Bp * Np * 4
        ),
    )

    out_p = pl.pallas_call(
        _exemplar_matmul_kernel,
        out_shape=jax.ShapeDtypeStruct((Bp, Np), jnp.float32),
        grid_spec=pltpu.PrefetchScalarGridSpec(
            num_scalar_prefetch=0,
            grid=grid,
            in_specs=[
                pl.BlockSpec((TB, TK), lambda i, j, k: (i, k)),
                pl.BlockSpec((TN, TK), lambda i, j, k: (j, k)),
            ],
            out_specs=pl.BlockSpec((TB, TN), lambda i, j, k: (i, j)),
        ),
        compiler_params=pltpu.CompilerParams(
            dimension_semantics=("parallel", "parallel", "arbitrary"),
            vmem_limit_bytes=vmem_limit,
        ),
        cost_estimate=cost,
    )(x_p, em_p)

    if Bp == B and Np == N:
        return out_p
    return out_p[:B, :N]


if __name__ == "__main__":
    key = jax.random.PRNGKey(0)
    k_in, k_em, k_tg = jax.random.split(key, 3)

    B, D, N = 8, 32, 16          # batch, feature dim, number of exemplars
    inputs = jax.random.normal(k_in, (B, D), dtype=jnp.float32)
    # Exemplar memory with L2-normalized rows (as the backward update maintains).
    em = jax.random.normal(k_em, (N, D), dtype=jnp.float32)
    em = em / jnp.linalg.norm(em, axis=1, keepdims=True)
    targets = jax.random.randint(k_tg, (B,), 0, N, dtype=jnp.int32)

    ref = inputs @ em.T

    # f32 path (exact check against the dense reference).
    out_f32 = exemplar_memory_forward(inputs, targets, em, alpha=0.01)
    out_f32 = jax.block_until_ready(out_f32)
    assert out_f32.shape == (B, N)
    assert out_f32.dtype == jnp.float32
    assert jnp.allclose(out_f32, ref, atol=1e-5, rtol=1e-5)

    # bf16-streaming path: compare against the f32 kernel (relative error check),
    # so any accidental drop of the f32 accumulation would be caught.
    out_bf16 = exemplar_memory_forward(
        inputs, targets, em, alpha=0.01, compute_dtype=jnp.bfloat16
    )
    out_bf16 = jax.block_until_ready(out_bf16)
    max_rel = jnp.max(jnp.abs(out_bf16 - out_f32) / (jnp.abs(out_f32) + 1.0))
    assert max_rel < 5e-2, f"bf16 path relative error too large: {max_rel}"

    print("KERNEL_OK")
</pallas_src>

<mosaic_0001>
module attributes {stable_mosaic.version = 11 : i64} {
  func.func @_exemplar_matmul_kernel(%arg0: i32, %arg1: i32, %arg2: i32, %arg3: memref<8x128xf32, #tpu.memory_space<vmem>>, %arg4: memref<128x128xf32, #tpu.memory_space<vmem>>, %arg5: memref<8x128xf32, #tpu.memory_space<vmem>>) attributes {dimension_semantics = [#tpu.dimension_semantics<parallel>, #tpu.dimension_semantics<parallel>, #tpu.dimension_semantics<arbitrary>], iteration_bounds = array<i64: 1, 1, 1>, scalar_prefetch = 0 : i64, scratch_operands = 0 : i64, tpu.core_type = #tpu.core_type<tc>, window_params = [{transform_indices = @transform_0, window_bounds = array<i64: 8, 128>}, {transform_indices = @transform_1, window_bounds = array<i64: 128, 128>}, {transform_indices = @transform_2, window_bounds = array<i64: 8, 128>}]} {
    %c0 = arith.constant 0 : index
    %c0_0 = arith.constant 0 : index
    %0 = vector.load %arg3[%c0, %c0_0] : memref<8x128xf32, #tpu.memory_space<vmem>>, vector<8x128xf32>
    %c0_1 = arith.constant 0 : index
    %c0_2 = arith.constant 0 : index
    %1 = vector.load %arg4[%c0_1, %c0_2] : memref<128x128xf32, #tpu.memory_space<vmem>>, vector<128x128xf32>
    %cst = arith.constant dense<0.000000e+00> : vector<8x128xf32>
    %2 = tpu.matmul %0, %1, %cst {dimension_numbers = #tpu.dot_dimension_numbers<[1], [1], [0], [0], [0, 0, 1, 0], [], []>} : vector<8x128xf32>, vector<128x128xf32>, vector<8x128xf32> -> vector<8x128xf32>
    %c0_i32 = arith.constant 0 : i32
    %3 = arith.cmpi eq, %arg2, %c0_i32 : i32
    %4 = arith.extui %3 : i1 to i32
    %c0_i32_3 = arith.constant 0 : i32
    %5 = arith.cmpi ne, %4, %c0_i32_3 : i32
    scf.if %5 {
      %c0_6 = arith.constant 0 : index
      %c0_7 = arith.constant 0 : index
      %9 = vector.load %arg5[%c0_6, %c0_7] : memref<8x128xf32, #tpu.memory_space<vmem>>, vector<8x128xf32>
      tpu.vector_store %arg5[%c0_6, %c0_7], %2 {strides = array<i32>} : memref<8x128xf32, #tpu.memory_space<vmem>>, vector<8x128xf32>,
    } else {
    }
    %c0_i32_4 = arith.constant 0 : i32
    %6 = arith.cmpi sgt, %arg2, %c0_i32_4 : i32
    %7 = arith.extui %6 : i1 to i32
    %c0_i32_5 = arith.constant 0 : i32
    %8 = arith.cmpi ne, %7, %c0_i32_5 : i32
    scf.if %8 {
      %c0_6 = arith.constant 0 : index
      %c0_7 = arith.constant 0 : index
      %9 = vector.load %arg5[%c0_6, %c0_7] : memref<8x128xf32, #tpu.memory_space<vmem>>, vector<8x128xf32>
      %10 = arith.addf %9, %2 : vector<8x128xf32>
      %c0_8 = arith.constant 0 : index
      %c0_9 = arith.constant 0 : index
      %11 = vector.load %arg5[%c0_8, %c0_9] : memref<8x128xf32, #tpu.memory_space<vmem>>, vector<8x128xf32>
      tpu.vector_store %arg5[%c0_8, %c0_9], %10 {strides = array<i32>} : memref<8x128xf32, #tpu.memory_space<vmem>>, vector<8x128xf32>,
    } else {
    }
    return
  }
  func.func @transform_0(%arg0: i32, %arg1: i32, %arg2: i32) -> (i32, i32) {
    %c0_i32 = arith.constant 0 : i32
    return %arg0, %arg2 : i32, i32
  }
  func.func @transform_1(%arg0: i32, %arg1: i32, %arg2: i32) -> (i32, i32) {
    %c0_i32 = arith.constant 0 : i32
    return %arg1, %arg2 : i32, i32
  }
  func.func @transform_2(%arg0: i32, %arg1: i32, %arg2: i32) -> (i32, i32) {
    %c0_i32 = arith.constant 0 : i32
    return %arg0, %arg1 : i32, i32
  }
}

</mosaic_0001>

<bundles_post_ra>
// kernel: tpu_custom_call.1
= control target key start
LH: loop header
LB: loop body
LE: loop exit
PB: predicated region body
PF: predicated region fallthrough
CT: control target
= control target key end

     0   :  { %7 = vsyncpa [#allocation3], 0  ;;  %s375_s0 = inlined_call_operand.hbm [shape: f32[8,128], index: 0, kind: input, shape index: {}]   ;;  %s376_s1 = inlined_call_operand.hbm [shape: f32[128,128], index: 1, kind: input, shape index: {}]   ;;  %s377_s2 = inlined_call_operand.hbm [shape: f32[8,128], index: 2, kind: output, shape index: {}]  }
   0x1   :  { %8 = vsyncpa [#allocation6], 0 }
   0x2   :  { %9 = vsyncpa [#allocation4], 0  ;;  %s309_s9 = smov [#allocation2]   ;;  %s310_s11 = smov [#allocation5]  }
   0x3   :  { %s16_s10 = sshll.u32 %s309_s9, 4  ;;  %s25_s12 = sshll.u32 %s310_s11, 4  ;;  %s17_s10 = int_to_ptr.vmem [resolvable:$true] %s16_s10  ;;  %s332_s12 = int_to_ptr.vmem [resolvable:$true] %s25_s12 }
   0x4   :  { %s237_s15 = scalar_lea.hbm %s375_s0, 128 }
   0x5   :  { %p238_p0 = scmp.ne.s32.totalorder %s375_s0, %s237_s15  ;;  %p241_p1 = scmp.lt.u32.totalorder %s237_s15, %s375_s0 }
   0x7   :  { %p243_p2 = pnand %p241_p1, %p238_p0 }
   0x9   :  { %246 = shalt.err (!%p243_p2)
}
   0xa   :  { %s247_s20 = scalar_lea.vmem %s17_s10, 128  ;;  %p252_p4 = scmp.lt.s32.totalorder %s17_s10, %s17_s10 }
   0xb   :  { %p248_p3 = scmp.ne.s32.totalorder %s17_s10, %s247_s20  ;;  %p253_p5 = scmp.lt.s32.totalorder %s247_s20, %s247_s20 }
   0xd   :  { %p254_p6 = por %p253_p5, %p252_p4 }
   0xf   :  { %p255_p7 = pnand %p254_p6, %p248_p3 }
  0x11   :  { %258 = shalt.err (!%p255_p7)
}
  0x12   :  { %19 = dma.hbm_to_vmem [thread:$0]  %s375_s0, 128, %s17_s10, [#allocation3]  }
  0x13   :  { %s259_s25 = scalar_lea.hbm %s376_s1, 2048 }
  0x14   :  { %p260_p8 = scmp.ne.s32.totalorder %s376_s1, %s259_s25  ;;  %p263_p9 = scmp.lt.u32.totalorder %s259_s25, %s376_s1 }
  0x16   :  { %p265_p10 = pnand %p263_p9, %p260_p8 }
  0x18   :  { %268 = shalt.err (!%p265_p10)
}
  0x19   :  { %s269_s30 = scalar_lea.vmem %s332_s12, 2048  ;;  %p274_p12 = scmp.lt.s32.totalorder %s332_s12, %s332_s12 }
  0x1a   :  { %p270_p11 = scmp.ne.s32.totalorder %s332_s12, %s269_s30  ;;  %p275_p13 = scmp.lt.s32.totalorder %s269_s30, %s269_s30 }
  0x1c   :  { %p276_p0 = por %p275_p13, %p274_p12 }
  0x1e   :  { %p277_p1 = pnand %p276_p0, %p270_p11 }
  0x20   :  { %280 = shalt.err (!%p277_p1)
}
  0x21   :  { %s311_s0 = smov 128   ;;  %s312_s3 = smov 8  }
  0x22   :  { %31 = dma.hbm_to_vmem [thread:$0]  %s376_s1, 2048, %s332_s12, [#allocation6], %s311_s0, %s311_s0, %s312_s3  }
  0x23   :  { %303 = dma.done.wait [#allocation3], 128  }
  0x24   :  { %304 = vsyncadd [#allocation3], 4294967168 }
  0x25   :  { %305 = dma.done.wait [#allocation6], 2048  }
  0x26   :  { %306 = vsyncadd [#allocation6], 4294965248  ;;  %v313_v0 = vmov 0.0|0.0   ;;  %vm314_vm0 = vmmov 0   ;;  %v315_v1 = vmov 0.0   ;;  %v39_v2 = vld [vmem:[#allocation5] sm:$0xff] }
  0x27   :  { %205 = vmatprep.subr.bf16.mxu0 %v313_v0  ;;  %202 = vmatprep.mubr.msk.f32.mxu0 %vm314_vm0, %v315_v1  ;;  %v40_v3 = vld [vmem:[#allocation5 + $0x8] sm:$0xff]  ;;  %v41_v5 = vld [vmem:[#allocation5 + $0x10] sm:$0xff]  ;;  %v42_v6 = vld [vmem:[#allocation5 + $0x18] sm:$0xff]  ;;  %s316_s1 = smov [#allocation7]  }
  0x28   :  { %v206_v4 = vpack.c.bf16 %v40_v3, %v39_v2  ;;  %v209_v7 = vpack.c.bf16 %v42_v6, %v41_v5  ;;  %v43_v8 = vld [vmem:[#allocation5 + $0x20] sm:$0xff]  ;;  %v44_v9 = vld [vmem:[#allocation5 + $0x28] sm:$0xff]  ;;  %v45_v11 = vld [vmem:[#allocation5 + $0x30] sm:$0xff]  ;;  %s143_s6 = sshll.u32 %s316_s1, 4  ;;  %s144_s6 = int_to_ptr.vmem [resolvable:$true] %s143_s6 }
  0x29   :  { %v212_v10 = vpack.c.bf16 %v44_v9, %v43_v8  ;;  %v46_v12 = vld [vmem:[#allocation5 + $0x38] sm:$0xff]  ;;  %v47_v14 = vld [vmem:[#allocation5 + $0x40] sm:$0xff]  ;;  %v48_v15 = vld [vmem:[#allocation5 + $0x48] sm:$0xff]  ;;  %s281_s7 = scalar_lea.vmem %s144_s6, 128  ;;  %p286_p3 = scmp.lt.s32.totalorder %s144_s6, %s144_s6 }
  0x2a   :  { %207 = vmatpush3.bf16.xpose.msra.mxu0 %v206_v4  ;;  %v215_v13 = vpack.c.bf16 %v46_v12, %v45_v11  ;;  %v218_v16 = vpack.c.bf16 %v48_v15, %v47_v14  ;;  %v49_v17 = vld [vmem:[#allocation5 + $0x50] sm:$0xff]  ;;  %v50_v18 = vld [vmem:[#allocation5 + $0x58] sm:$0xff]  ;;  %v51_v20 = vld [vmem:[#allocation5 + $0x60] sm:$0xff]  ;;  %p282_p2 = scmp.ne.s32.totalorder %s144_s6, %s281_s7  ;;  %p287_p4 = scmp.lt.s32.totalorder %s281_s7, %s281_s7 }
  0x2b   :  { %208 = vmatprep.subr.bf16.mxu0 %v313_v0  ;;  %v221_v19 = vpack.c.bf16 %v50_v18, %v49_v17  ;;  %v52_v21 = vld [vmem:[#allocation5 + $0x68] sm:$0xff]  ;;  %v53_v23 = vld [vmem:[#allocation5 + $0x70] sm:$0xff]  ;;  %v54_v24 = vld [vmem:[#allocation5 + $0x78] sm:$0xff] }
  0x2c   :  { %v224_v22 = vpack.c.bf16 %v52_v21, %v51_v20  ;;  %v227_v25 = vpack.c.bf16 %v54_v24, %v53_v23  ;;  %v38_v26 = vld [vmem:[#allocation2] sm:$0xff]  ;;  %p288_p5 = por %p287_p4, %p286_p3 }
  0x2e   :  { %p289_p6 = pnand %p288_p5, %p282_p2 }
  0x32   :  { %210 = vmatpush3.bf16.xpose.msra.mxu0 %v209_v7 }
  0x33   :  { %211 = vmatprep.subr.bf16.mxu0 %v313_v0 }
  0x3a   :  { %213 = vmatpush3.bf16.xpose.msra.mxu0 %v212_v10 }
  0x3b   :  { %214 = vmatprep.subr.bf16.mxu0 %v313_v0 }
  0x42   :  { %216 = vmatpush3.bf16.xpose.msra.mxu0 %v215_v13 }
  0x43   :  { %217 = vmatprep.subr.bf16.mxu0 %v313_v0 }
  0x4a   :  { %219 = vmatpush3.bf16.xpose.msra.mxu0 %v218_v16 }
  0x4b   :  { %220 = vmatprep.subr.bf16.mxu0 %v313_v0 }
  0x52   :  { %222 = vmatpush3.bf16.xpose.msra.mxu0 %v221_v19 }
  0x53   :  { %223 = vmatprep.subr.bf16.mxu0 %v313_v0 }
  0x5a   :  { %225 = vmatpush3.bf16.xpose.msra.mxu0 %v224_v22 }
  0x5b   :  { %226 = vmatprep.subr.bf16.mxu0 %v313_v0 }
  0x62   :  { %228 = vmatpush3.bf16.xpose.msra.mxu0 %v227_v25 }
  0x69   :  { %203 = vmatmul.mubr.f32.vlgmr.msra.gmra.mrb[0].mxu0 %v38_v26 }
 0x13c   :  { %v121_v27 = vpop.f32.mrb[0].mxu0 }
 0x13d   :  { %129 = vst [vmem:[#allocation7] sm:$0xff] %v121_v27  ;;  %v204_v28 = vpop.f32.mrb[1].mxu0 }
 0x13e   :  { %292 = shalt.err (!%p289_p6)
}
 0x13f   :  { %s293_s10 = scalar_lea.hbm %s377_s2, 128 }
 0x140   :  { %p294_p7 = scmp.ne.s32.totalorder %s377_s2, %s293_s10  ;;  %p297_p8 = scmp.lt.u32.totalorder %s293_s10, %s377_s2 }
 0x142   :  { %p299_p9 = pnand %p297_p8, %p294_p7 }
 0x144   :  { %302 = shalt.err (!%p299_p9)
}
 0x145   :  { %146 = dma.vmem_to_hbm [thread:$0]  %s144_s6, 128, %s377_s2, [#allocation4]  }
 0x146   :  { %307 = dma.done.wait [#allocation4], 128  }
 0x147   :  { %308 = vsyncadd [#allocation4], 4294967168 }
 0x148   :  { %150 = vsyncpa [#allocation3], 1 }
 0x149   :  { %151 = vsyncpa [#allocation6], 1 }
 0x14a   :  { %152 = vsyncpa [#allocation4], 1 }

</bundles_post_ra>
